<compile_context>
chip_gen: v5e
topology: v5e:2x2
jax: 0.10.0
libtpu: 0.0.40
codegen_flags: <defaults>
</compile_context>

<pallas_src>
import functools

import jax
import jax.numpy as jnp
from jax.experimental import pallas as pl
from jax.experimental.pallas import tpu as pltpu


def _multiloss_kernel(x_ref, t_ref, o_ref, acc_ref, *, ce_scale, bce_scale):
    j = pl.program_id(1)

    @pl.when(j == 0)
    def _():
        acc_ref[...] = jnp.zeros_like(acc_ref)

    x = x_ref[...].astype(jnp.float32)   # (TN, C, T_SUB, 128), spatial minor dims
    t = t_ref[...].astype(jnp.float32)

    # --- CrossEntropyLoss with probability targets:
    #     -sum_c t*log_softmax(x) = lse*sum_c(t) - sum_c(t*x)
    # C is a non-layout axis -> these reductions are cheap per-vreg VPU ops.
    m = jnp.max(x, axis=1, keepdims=True)
    lse = m + jnp.log(jnp.sum(jnp.exp(x - m), axis=1, keepdims=True))  # (TN,1,T_SUB,128)
    sum_t = jnp.sum(t, axis=1)                                         # (TN,T_SUB,128)
    sum_tx = jnp.sum(t * x, axis=1)
    ce = lse[:, 0, :, :] * sum_t - sum_tx

    # --- BCEWithLogitsLoss, numerically stable softplus form, reduced over C:
    #     max(x,0) - x*t + log1p(exp(-|x|))
    bce = jnp.sum(jnp.maximum(x, 0.0) - x * t + jnp.log1p(jnp.exp(-jnp.abs(x))),
                  axis=1)                                              # (TN,T_SUB,128)

    # Mean reductions are pre-folded into the scales; accumulate elementwise.
    contrib = ce_scale * ce + bce_scale * bce
    acc_ref[...] += jnp.sum(contrib, axis=0)                           # (T_SUB,128)

    @pl.when(j == pl.num_programs(1) - 1)
    def _():
        # One cheap sublane (XLU) reduce per batch block; lanes + batch blocks
        # are summed in the wrapper (tiny XLA reduce).
        o_ref[0] = jnp.sum(acc_ref[...], axis=0, keepdims=True)        # (1,128)


def multi_loss(predictions, targets, *, w_ce=0.6, w_bce=0.4,
               target_block_bytes=4 * 1024 * 1024):
    """Weighted CrossEntropyLoss(prob targets) + BCEWithLogitsLoss, both 'mean'."""
    N, C, H, W = predictions.shape
    assert targets.shape == predictions.shape
    hw = H * W
    rows = N * hw            # CE mean divisor (number of (n,h,w) positions)
    n_elems = rows * C       # BCE mean divisor (total element count)
    itemsize = jnp.dtype(predictions.dtype).itemsize

    # Free, contiguous views of NCHW -- no transpose, inputs pass through in
    # their native dtype (upcast to f32 happens inside the kernel).
    x = predictions.reshape(N, C, hw)
    t = targets.reshape(N, C, hw)

    max_t_sub = max(1, target_block_bytes // (C * 128 * itemsize))

    def pick_t_sub(n_sub):
        # Largest divisor of n_sub that is a multiple of 8 (or n_sub itself)
        # and fits the per-block byte target.
        best = None
        d = 1
        while d * d <= n_sub:
            if n_sub % d == 0:
                for cand in (d, n_sub // d):
                    if cand <= max_t_sub and (cand % 8 == 0 or cand == n_sub):
                        best = cand if best is None else max(best, cand)
            d += 1
        return best

    hw_pad = hw
    t_sub = pick_t_sub(hw // 128) if hw % 128 == 0 else None
    if t_sub is None:
        # Rare fallback: pad HW up to a multiple of 1024 (one extra XLA pass).
        # Pad values contribute exactly 0: x=-1e9 (softplus underflows to 0,
        # lse finite), t=0 (zero CE weight), so no per-step masking is needed.
        hw_pad = ((hw + 1023) // 1024) * 1024
        pad = hw_pad - hw
        x = jnp.pad(x, ((0, 0), (0, 0), (0, pad)), constant_values=-1e9)
        t = jnp.pad(t, ((0, 0), (0, 0), (0, pad)), constant_values=0)
        t_sub = pick_t_sub(hw_pad // 128)
        if t_sub is None:       # huge-C corner case; 8 always divides hw_pad/128
            t_sub = 8
    n_sub = hw_pad // 128

    x = x.reshape(N, C, n_sub, 128)
    t = t.reshape(N, C, n_sub, 128)

    # Batch tile: a divisor of N (no ragged batch tail); keep >= 2 batch blocks
    # when N >= 2 so the "parallel" leading axis can split across TCs on v7x.
    block_one = C * t_sub * 128 * itemsize
    tn_cap = min(N, max(1, target_block_bytes // block_one))
    if N >= 2:
        tn_cap = min(tn_cap, N // 2)
    tn = max(d for d in range(1, tn_cap + 1) if N % d == 0)

    n_bb = N // tn
    n_hw = n_sub // t_sub

    # Explicit VMEM budget: 2 inputs x 2 pipeline buffers x block + accumulator.
    block_bytes = tn * block_one
    footprint = 2 * 2 * block_bytes + t_sub * 128 * 4 + 8 * 128 * 4
    vmem_limit = int(min(64 * 2**20, max(32 * 2**20, 2 * footprint)))

    kernel = functools.partial(
        _multiloss_kernel,
        ce_scale=float(w_ce) / float(rows),
        bce_scale=float(w_bce) / float(n_elems))

    cost = pl.CostEstimate(
        flops=12 * n_elems,
        transcendentals=3 * n_elems,
        bytes_accessed=2 * n_elems * itemsize + n_bb * 128 * 4)

    partials = pl.pallas_call(
        kernel,
        out_shape=jax.ShapeDtypeStruct((n_bb, 1, 128), jnp.float32),
        grid_spec=pltpu.PrefetchScalarGridSpec(
            num_scalar_prefetch=0,
            grid=(n_bb, n_hw),
            in_specs=[
                pl.BlockSpec((tn, C, t_sub, 128), lambda nb, j: (nb, 0, j, 0)),
                pl.BlockSpec((tn, C, t_sub, 128), lambda nb, j: (nb, 0, j, 0)),
            ],
            out_specs=pl.BlockSpec((1, 1, 128), lambda nb, j: (nb, 0, 0)),
            scratch_shapes=[pltpu.VMEM((t_sub, 128), jnp.float32)]),
        compiler_params=pltpu.CompilerParams(
            dimension_semantics=("parallel", "arbitrary"),
            vmem_limit_bytes=vmem_limit),
        cost_estimate=cost,
    )(x, t)

    # Tiny final reduction over per-batch-block (per-core) lane partials.
    return jnp.sum(partials)


def _reference(predictions, targets, w_ce=0.6, w_bce=0.4):
    """Pure-JAX reference mirroring torch CrossEntropyLoss / BCEWithLogitsLoss."""
    x = jnp.transpose(predictions, (0, 2, 3, 1)).astype(jnp.float32)
    t = jnp.transpose(targets, (0, 2, 3, 1)).astype(jnp.float32)
    logp = jax.nn.log_softmax(x, axis=-1)
    ce = jnp.mean(jnp.sum(-t * logp, axis=-1))
    bce = jnp.mean(jnp.maximum(x, 0.0) - x * t + jnp.log1p(jnp.exp(-jnp.abs(x))))
    return w_ce * ce + w_bce * bce


if __name__ == "__main__":
    # Module config (deterministic, in-script):
    #   loss_funcs = {
    #     "ce":  {"name": "CrossEntropyLoss",  "param": {}, "weight": 0.6},
    #     "bce": {"name": "BCEWithLogitsLoss", "param": {}, "weight": 0.4},
    #   }
    N, C, H, W = 2, 4, 16, 16
    key = jax.random.PRNGKey(0)
    kx, kt = jax.random.split(key)
    predictions = jax.random.normal(kx, (N, C, H, W), dtype=jnp.float32)
    # Targets: probability distributions over channel dim (valid for both losses).
    targets = jax.nn.softmax(
        jax.random.normal(kt, (N, C, H, W), dtype=jnp.float32), axis=1)

    loss = multi_loss(predictions, targets, w_ce=0.6, w_bce=0.4)
    loss = jax.block_until_ready(loss)

    ref = _reference(predictions, targets, 0.6, 0.4)
    assert jnp.allclose(loss, ref, atol=1e-5, rtol=1e-5), (loss, ref)
    print("KERNEL_OK")
</pallas_src>

<mosaic_0001>
module attributes {stable_mosaic.version = 11 : i64} {
  func.func @_multiloss_kernel(%arg0: i32, %arg1: i32, %arg2: memref<1x4x2x128xf32, #tpu.memory_space<vmem>>, %arg3: memref<1x4x2x128xf32, #tpu.memory_space<vmem>>, %arg4: memref<1x1x128xf32, #tpu.memory_space<vmem>>, %arg5: memref<2x128xf32, #tpu.memory_space<vmem>>) attributes {dimension_semantics = [#tpu.dimension_semantics<parallel>, #tpu.dimension_semantics<arbitrary>], iteration_bounds = array<i64: 2, 1>, scalar_prefetch = 0 : i64, scratch_operands = 1 : i64, tpu.core_type = #tpu.core_type<tc>, window_params = [{transform_indices = @transform_0, window_bounds = array<i64: 1, 4, 2, 128>}, {transform_indices = @transform_1, window_bounds = array<i64: 1, 4, 2, 128>}, {transform_indices = @transform_2, window_bounds = array<i64: 1, 1, 128>}]} {
    %c0_i32 = arith.constant 0 : i32
    %0 = arith.cmpi eq, %arg1, %c0_i32 : i32
    %1 = arith.extui %0 : i1 to i32
    %c0_i32_0 = arith.constant 0 : i32
    %2 = arith.cmpi ne, %1, %c0_i32_0 : i32
    scf.if %2 {
      %cst_23 = arith.constant 0.000000e+00 : f32
      %43 = vector.broadcast %cst_23 : f32 to vector<2x128xf32>
      %c0_24 = arith.constant 0 : index
      %c0_25 = arith.constant 0 : index
      %44 = vector.load %arg5[%c0_24, %c0_25] : memref<2x128xf32, #tpu.memory_space<vmem>>, vector<2x128xf32>
      tpu.vector_store %arg5[%c0_24, %c0_25], %43 {strides = array<i32>} : memref<2x128xf32, #tpu.memory_space<vmem>>, vector<2x128xf32>,
    } else {
    }
    %c0 = arith.constant 0 : index
    %c0_1 = arith.constant 0 : index
    %c0_2 = arith.constant 0 : index
    %c0_3 = arith.constant 0 : index
    %3 = vector.load %arg2[%c0, %c0_1, %c0_2, %c0_3] : memref<1x4x2x128xf32, #tpu.memory_space<vmem>>, vector<1x4x2x128xf32>
    %c0_4 = arith.constant 0 : index
    %c0_5 = arith.constant 0 : index
    %c0_6 = arith.constant 0 : index
    %c0_7 = arith.constant 0 : index
    %4 = vector.load %arg3[%c0_4, %c0_5, %c0_6, %c0_7] : memref<1x4x2x128xf32, #tpu.memory_space<vmem>>, vector<1x4x2x128xf32>
    %cst = arith.constant dense<0xFF800000> : vector<1x2x128xf32>
    %5 = vector.multi_reduction <maximumf>, %3, %cst [1] : vector<1x4x2x128xf32> to vector<1x2x128xf32>
    %6 = vector.shape_cast %5 : vector<1x2x128xf32> to vector<1x1x2x128xf32>
    %7 = vector.broadcast %6 : vector<1x1x2x128xf32> to vector<1x4x2x128xf32>
    %8 = arith.subf %3, %7 : vector<1x4x2x128xf32>
    %9 = math.exp %8 : vector<1x4x2x128xf32>
    %cst_8 = arith.constant dense<0.000000e+00> : vector<1x2x128xf32>
    %10 = vector.multi_reduction <add>, %9, %cst_8 [1] : vector<1x4x2x128xf32> to vector<1x2x128xf32>
    %11 = vector.shape_cast %10 : vector<1x2x128xf32> to vector<1x1x2x128xf32>
    %12 = math.log %11 : vector<1x1x2x128xf32>
    %13 = arith.addf %6, %12 : vector<1x1x2x128xf32>
    %cst_9 = arith.constant dense<0.000000e+00> : vector<1x2x128xf32>
    %14 = vector.multi_reduction <add>, %4, %cst_9 [1] : vector<1x4x2x128xf32> to vector<1x2x128xf32>
    %15 = arith.mulf %4, %3 : vector<1x4x2x128xf32>
    %cst_10 = arith.constant dense<0.000000e+00> : vector<1x2x128xf32>
    %16 = vector.multi_reduction <add>, %15, %cst_10 [1] : vector<1x4x2x128xf32> to vector<1x2x128xf32>
    %17 = vector.shape_cast %13 : vector<1x1x2x128xf32> to vector<1x2x128xf32>
    %18 = arith.mulf %17, %14 : vector<1x2x128xf32>
    %19 = arith.subf %18, %16 : vector<1x2x128xf32>
    %cst_11 = arith.constant 0.000000e+00 : f32
    %20 = vector.broadcast %cst_11 : f32 to vector<1x4x2x128xf32>
    %21 = arith.maximumf %3, %20 : vector<1x4x2x128xf32>
    %22 = arith.mulf %3, %4 : vector<1x4x2x128xf32>
    %23 = arith.subf %21, %22 : vector<1x4x2x128xf32>
    %24 = math.absf %3 : vector<1x4x2x128xf32>
    %cst_12 = arith.constant 0.000000e+00 : f32
    %25 = vector.broadcast %cst_12 : f32 to vector<1x4x2x128xf32>
    %26 = arith.subf %25, %24 : vector<1x4x2x128xf32>
    %27 = math.exp %26 : vector<1x4x2x128xf32>
    %28 = math.log1p %27 : vector<1x4x2x128xf32>
    %29 = arith.addf %23, %28 : vector<1x4x2x128xf32>
    %cst_13 = arith.constant dense<0.000000e+00> : vector<1x2x128xf32>
    %30 = vector.multi_reduction <add>, %29, %cst_13 [1] : vector<1x4x2x128xf32> to vector<1x2x128xf32>
    %cst_14 = arith.constant 0.00117187505 : f32
    %31 = vector.broadcast %cst_14 : f32 to vector<1x2x128xf32>
    %32 = arith.mulf %31, %19 : vector<1x2x128xf32>
    %cst_15 = arith.constant 1.95312503E-4 : f32
    %33 = vector.broadcast %cst_15 : f32 to vector<1x2x128xf32>
    %34 = arith.mulf %33, %30 : vector<1x2x128xf32>
    %35 = arith.addf %32, %34 : vector<1x2x128xf32>
    %c0_16 = arith.constant 0 : index
    %c0_17 = arith.constant 0 : index
    %36 = vector.load %arg5[%c0_16, %c0_17] : memref<2x128xf32, #tpu.memory_space<vmem>>, vector<2x128xf32>
    %cst_18 = arith.constant dense<0.000000e+00> : vector<2x128xf32>
    %37 = vector.multi_reduction <add>, %35, %cst_18 [0] : vector<1x2x128xf32> to vector<2x128xf32>
    %38 = arith.addf %36, %37 : vector<2x128xf32>
    %c0_19 = arith.constant 0 : index
    %c0_20 = arith.constant 0 : index
    %39 = vector.load %arg5[%c0_19, %c0_20] : memref<2x128xf32, #tpu.memory_space<vmem>>, vector<2x128xf32>
    tpu.vector_store %arg5[%c0_19, %c0_20], %38 {strides = array<i32>} : memref<2x128xf32, #tpu.memory_space<vmem>>, vector<2x128xf32>,
    %c0_i32_21 = arith.constant 0 : i32
    %40 = arith.cmpi eq, %arg1, %c0_i32_21 : i32
    %41 = arith.extui %40 : i1 to i32
    %c0_i32_22 = arith.constant 0 : i32
    %42 = arith.cmpi ne, %41, %c0_i32_22 : i32
    scf.if %42 {
      %c0_23 = arith.constant 0 : index
      %c0_24 = arith.constant 0 : index
      %43 = vector.load %arg5[%c0_23, %c0_24] : memref<2x128xf32, #tpu.memory_space<vmem>>, vector<2x128xf32>
      %cst_25 = arith.constant dense<0.000000e+00> : vector<128xf32>
      %44 = vector.multi_reduction <add>, %43, %cst_25 [0] : vector<2x128xf32> to vector<128xf32>
      %45 = vector.shape_cast %44 : vector<128xf32> to vector<1x128xf32>
      %c0_26 = arith.constant 0 : index
      %c0_27 = arith.constant 0 : index
      %c0_28 = arith.constant 0 : index
      %46 = vector.load %arg4[%c0_26, %c0_27, %c0_28] : memref<1x1x128xf32, #tpu.memory_space<vmem>>, vector<1x1x128xf32>
      %47 = vector.shape_cast %46 : vector<1x1x128xf32> to vector<1x128xf32>
      %48 = vector.shape_cast %45 : vector<1x128xf32> to vector<1x1x128xf32>
      tpu.vector_store %arg4[%c0_26, %c0_27, %c0_28], %48 {strides = array<i32>} : memref<1x1x128xf32, #tpu.memory_space<vmem>>, vector<1x1x128xf32>,
    } else {
    }
    return
  }
  func.func @transform_0(%arg0: i32, %arg1: i32) -> (i32, i32, i32, i32) {
    %c0_i32 = arith.constant 0 : i32
    %c0_i32_0 = arith.constant 0 : i32
    %c0_i32_1 = arith.constant 0 : i32
    return %arg0, %c0_i32, %arg1, %c0_i32_0 : i32, i32, i32, i32
  }
  func.func @transform_1(%arg0: i32, %arg1: i32) -> (i32, i32, i32, i32) {
    %c0_i32 = arith.constant 0 : i32
    %c0_i32_0 = arith.constant 0 : i32
    %c0_i32_1 = arith.constant 0 : i32
    return %arg0, %c0_i32, %arg1, %c0_i32_0 : i32, i32, i32, i32
  }
  func.func @transform_2(%arg0: i32, %arg1: i32) -> (i32, i32, i32) {
    %c0_i32 = arith.constant 0 : i32
    %c0_i32_0 = arith.constant 0 : i32
    %c0_i32_1 = arith.constant 0 : i32
    return %arg0, %c0_i32, %c0_i32_0 : i32, i32, i32
  }
}

</mosaic_0001>

<bundles_post_ra>
// kernel: tpu_custom_call.1
= control target key start
LH: loop header
LB: loop body
LE: loop exit
PB: predicated region body
PF: predicated region fallthrough
CT: control target
= control target key end

     0   :  { %7 = vsyncpa [#allocation4], 0  ;;  %s985_s0 = inlined_call_operand.hbm [shape: f32[2,4,2,128], index: 0, kind: input, shape index: {}]   ;;  %s986_s1 = inlined_call_operand.hbm [shape: f32[2,4,2,128], index: 1, kind: input, shape index: {}]   ;;  %s987_s2 = inlined_call_operand.hbm [shape: f32[2,1,128], index: 2, kind: output, shape index: {}]  }
   0x1   :  { %9 = vsyncpa [#allocation4 + $0x1], 0 }
   0x2   :  { %10 = vsyncpa [#allocation7], 0 }
   0x3   :  { %12 = vsyncpa [#allocation7 + $0x1], 0 }
   0x4   :  { %13 = vsyncpa [#allocation5], 0 }
   0x5   :  { %15 = vsyncpa [#allocation5 + $0x1], 0  ;;  %s769_s9 = smov 0   ;;  %s771_s10 = smov 0  }
   0x6   :  { %s773_s11 = smov 0   ;;  %s775_s12 = smov 0  }
   0x7   :  { %s777_s13 = smov 0   ;;  %s779_s14 = smov 0  }
   0x8 LB: > { %s490_s15 = sadd.s32 4294967295, %s749_s14   ;;  %s491_s16 = sadd.s32 4294967294, %s749_s14   ;;  %s749_s14 = sphi %s779_s14, %s21_s14   ;;  %s745_s13 = sphi %s777_s13, %s1001_s13   ;;  %s741_s12 = sphi %s775_s12, %s1000_s12   ;;  %s737_s11 = sphi %s773_s11, %s999_s11   ;;  %s733_s10 = sphi %s771_s10, %s998_s10   ;;  %s729_s9 = sphi %s769_s9, %s997_s9  }
   0x9   : > { %s33_s17 = sadd.s32 1, %s745_s13  ;;  %s42_s18 = sadd.s32 1, %s737_s11 }
   0xa   : > { %p35_p0 = scmp.ge.s32.totalorder %s33_s17, 2  ;;  %p49_p1 = scmp.ne.s32.totalorder %s737_s11, %s733_s10 }
   0xb   : > { %p50_p2 = scmp.eq.s32.totalorder %s749_s14, 0  ;;  %p55_p3 = scmp.ne.s32.totalorder %s733_s10, %s729_s9 }
   0xc   : > { %s1003_s17 = smov (%p35_p0, %s33_s17), 0  ;;  %p56_p5 = scmp.eq.s32.totalorder %s490_s15, 0 }
   0xd   : > { %p810_p4 = por %p50_p2, %p49_p1  ;;  %s37_s20 = ssub.s32 %s745_s13, %s1003_s17 }
   0xe   : > { %p107_p6 = scmp.eq.s32.totalorder %s490_s15, 1  ;;  %p40_p7 = scmp.eq.s32.totalorder %s37_s20, 0 }
   0xf   : > { %p816_p8 = por %p56_p5, %p55_p3  ;;  %p113_p10 = scmp.eq.s32.totalorder %s491_s16, 1 }
  0x10   : > { %p820_p9 = por %p107_p6, %p49_p1  ;;  %p493_p12 = scmp.ge.s32.totalorder %s749_s14, 2 }
  0x11   : > { %s825_s23 = scalar_select %p40_p7, %s737_s11, %s42_s18  }
  0x12   : > { %p827_p11 = por %p113_p10, %p55_p3  ;;  %p524_p13 = scmp.lt.s32.totalorder %s749_s14, 2 }
  0x13   : > { %s834_s25 = sand.u32 1, %s737_s11   ;;  %s505_s27 = sshll.u32 %s745_s13, 3 }
  0x14   : > { %s494_s26 = sshll.u32 %s834_s25, 3  ;;  %s143_s30 = scalar_lea.hbm %s985_s0, %s505_s27 }
  0x15   : > { %s137_s3 = scalar_lea.vmem [#allocation3], %s494_s26  ;;  %s144_s5 = sshll.u32 %s143_s30, 4  ;;  %s145_s5 = int_to_ptr.hbm [resolvable:$true] %s144_s5 }
  0x16   : > { %s146_s4 = sshll.u32 %s137_s3, 4  ;;  %p843_p0 = pnand %p524_p13, %p810_p4  ;;  %s147_s4 = int_to_ptr.vmem [resolvable:$true] %s146_s4 }
  0x17   : > { %p500_p1 = scmp.ge.s32.totalorder %s749_s14, 1  ;;  %s134_s7 = scalar_lea.sflag [#allocation4], %s834_s25 }
  0x18   : > { %s751_s8 = smov 32   ;;  %s752_s15 = smov 2  }
  0x19   : > { %516 = dma.hbm_to_vmem [thread:$0]  (!%p843_p0), %s145_s5, 128, %s147_s4, %s134_s7, %s751_s8, %s751_s8, %s752_s15  }
  0x1a   : > { %p177_p2 = scmp.lt.s32.totalorder %s749_s14, 3  ;;  %s166_s20 = scalar_lea.hbm %s986_s1, %s505_s27 }
  0x1b   : > { %s167_s28 = sshll.u32 %s166_s20, 4  ;;  %s160_s19 = scalar_lea.vmem [#allocation6], %s494_s26  ;;  %s168_s28 = int_to_ptr.hbm [resolvable:$true] %s167_s28 }
  0x1c   : > { %p178_p3 = pnand %p500_p1, %p177_p2  ;;  %s169_s29 = sshll.u32 %s160_s19, 4  ;;  %s170_s29 = int_to_ptr.vmem [resolvable:$true] %s169_s29 }
  0x1d   : > { %s157_s30 = scalar_lea.sflag [#allocation7], %s834_s25  ;;  %s859_s3 = sand.u32 (!%p178_p3), 1, %s733_s10  }
  0x1e   : > { %519 = dma.hbm_to_vmem [thread:$0]  (!%p843_p0), %s168_s28, 128, %s170_s29, %s157_s30, %s751_s8, %s751_s8, %s752_s15  }
  0x1f   : > { %181 = sbr.rel (%p178_p3) target bundleno = 117 (0x75), region = 28  ;;  %s501_s4 = sshll.u32 (!%p178_p3), %s859_s3, 3 }
  0x20   : > { %s184_s5 = scalar_lea.sflag (!%p178_p3), [#allocation4], %s859_s3  ;;  %s187_s7 = scalar_lea.vmem (!%p178_p3), [#allocation3], %s501_s4 }
  0x24   : > { %716 = dma.done.wait (%p816_p8), %s184_s5, 128  }
  0x25   : > { %718 = vsyncadd (%p816_p8), %s184_s5, 4294967168  ;;  %s194_s25 = scalar_lea.sflag [#allocation7], %s859_s3  ;;  %s868_s26 = scalar_lea.vmem [#allocation6], %s501_s4 }
  0x26   : > { %720 = dma.done.wait (%p816_p8), %s194_s25, 128  }
  0x27   : > { %722 = vsyncadd (%p816_p8), %s194_s25, 4294967168  ;;  %v753_v0 = vmov 0.0   ;;  %vm236_vm0 = vcmask 1041408   ;;  %v874_v1 = vld [vmem:[%s187_s7] sm:$0x3]  ;;  %s385_s6 = scalar_lea.hbm %s987_s2, %s741_s12  ;;  %s222_s8 = scalar_lea.vmem [#allocation8], %s859_s3 }
  0x28   : > { %227 = vst [vmem:[#allocation2] sm:$0x3] %v753_v0  ;;  %v876_v2 = vld [vmem:[%s187_s7 + $0x2] sm:$0x3]  ;;  %v878_v3 = vld [vmem:[%s187_s7 + $0x4] sm:$0x3] }
  0x29   : > { %v880_v4 = vld [vmem:[%s187_s7 + $0x6] sm:$0x3]  ;;  %v237_v5 = vsel %vm236_vm0, %v874_v1, -inf  ;;  %v238_v6 = vsel %vm236_vm0, %v876_v2, -inf  ;;  %v239_v7 = vsel %vm236_vm0, %v878_v3, -inf  ;;  %s387_s15 = sshll.u32 %s222_s8, 4  ;;  %s388_s15 = int_to_ptr.vmem [resolvable:$true] %s387_s15 }
  0x2a   : > { %v240_v8 = vsel %vm236_vm0, %v880_v4, -inf  ;;  %v241_v9 = vmax.f32 %v237_v5, %v238_v6  ;;  %v294_v20 = vand.u32 2147483647, %v874_v1  ;;  %v295_v21 = vand.u32 2147483647, %v876_v2  ;;  %s389_s16 = sshll.u32 %s385_s6, 4  ;;  %s390_s16 = int_to_ptr.hbm [resolvable:$true] %s389_s16 }
  0x2b   : > { %v242_v10 = vmax.f32 %v239_v7, %v240_v8  ;;  %v296_v22 = vand.u32 2147483647, %v878_v3  ;;  %v297_v23 = vand.u32 2147483647, %v880_v4  ;;  %v232_v28 = vld [vmem:[%s868_s26] sm:$0x3] }
  0x2c   : > { %v298_v24 = vsub.f32 0.0, %v294_v20  ;;  %v299_v25 = vsub.f32 0.0, %v295_v21  ;;  %v233_v31 = vld [vmem:[%s868_s26 + $0x2] sm:$0x3]  ;;  %v273_v37 = vmul.f32 %v232_v28, %v874_v1  ;;  %v266_v40 = vsel %vm236_vm0, %v232_v28, 0.0  ;;  %s377_s18 = scalar_lea.sflag [#allocation5], %s859_s3 }
  0x2d   : > { %v890_v11 = vmax.f32 %v241_v9, %v242_v10  ;;  %v300_v26 = vsub.f32 0.0, %v296_v22  ;;  %v301_v27 = vsub.f32 0.0, %v297_v23  ;;  %v274_v41 = vmul.f32 %v233_v31, %v876_v2  ;;  %v234_v43 = vld [vmem:[%s868_s26 + $0x4] sm:$0x3]  ;;  %v235_v50 = vld [vmem:[%s868_s26 + $0x6] sm:$0x3] }
  0x2e   : > { %v302_v29 = vmul.f32 1.442695, %v298_v24  ;;  %v304_v30 = vmul.f32 1.442695, %v299_v25  ;;  %v267_v46 = vsel %vm236_vm0, %v233_v31, 0.0  ;;  %v277_v48 = vsel %vm236_vm0, %v273_v37, 0.0 }
  0x2f   : > { %v244_v12 = vsub.f32 %v874_v1, %v890_v11  ;;  %v245_v13 = vsub.f32 %v876_v2, %v890_v11  ;;  %v246_v14 = vsub.f32 %v878_v3, %v890_v11  ;;  %v247_v15 = vsub.f32 %v880_v4, %v890_v11  ;;  %s677_s20 = sshra.s32 %s390_s16, 4  ;;  %s683_s12 = scalar_lea.hbm %s987_s2, 2  ;;  %s678_s20 = int_to_ptr.hbm [resolvable:$true] %s677_s20 }
  0x30   : > { %v306_v32 = vmul.f32 1.442695, %v300_v26  ;;  %v308_v33 = vmul.f32 1.442695, %v301_v27  ;;  %v278_v49 = vsel %vm236_vm0, %v274_v41, 0.0  ;;  %v268_v53 = vadd.f32 %v267_v46, %v266_v40  ;;  %s679_s28 = scalar_lea.hbm %s678_s20, 1  ;;  %p684_p7 = scmp.lt.s32.totalorder %s678_s20, %s987_s2 }
  0x31   : > { %v248_v16 = vmul.f32 1.442695, %v244_v12  ;;  %v250_v17 = vmul.f32 1.442695, %v245_v13  ;;  %v252_v18 = vmul.f32 1.442695, %v246_v14  ;;  %v275_v56 = vmul.f32 %v234_v43, %v878_v3  ;;  %p680_p4 = scmp.ne.s32.totalorder %s678_s20, %s679_s28  ;;  %p685_p8 = scmp.lt.s32.totalorder %s683_s12, %s679_s28 }
  0x32   : > { %v254_v19 = vmul.f32 1.442695, %v247_v15  ;;  %v269_v54 = vsel %vm236_vm0, %v234_v43, 0.0  ;;  %v271_v55 = vsel %vm236_vm0, %v235_v50, 0.0  ;;  %v279_v59 = vadd.f32 %v278_v49, %v277_v48 }
  0x33   : > { %577 = vpow2.f32 %v248_v16  ;;  %v276_v63 = vmul.f32 %v235_v50, %v880_v4  ;;  %v280_v0 = vsel %vm236_vm0, %v275_v56, 0.0  ;;  %v286_v8 = vmax.f32 %v874_v1, 0.0  ;;  %p681_p5 = pnand %p680_p4, %p820_p9  ;;  %p686_p10 = por %p685_p8, %p684_p7 }
  0x34   : > { %579 = vpow2.f32 %v250_v17  ;;  %v287_v9 = vmax.f32 %v876_v2, 0.0  ;;  %v270_v12 = vadd.f32 %v269_v54, %v268_v53  ;;  %v281_v15 = vadd.f32 %v280_v0, %v279_v59 }
  0x35   : > { %581 = vpow2.f32 %v252_v18  ;;  %v282_v13 = vsel %vm236_vm0, %v276_v63, 0.0  ;;  %v288_v21 = vmax.f32 %v878_v3, 0.0  ;;  %v289_v23 = vmax.f32 %v880_v4, 0.0  ;;  %p682_p6 = pneg %p681_p5 }
  0x36   : > { %583 = vpow2.f32 %v254_v19  ;;  %v272_v2 = vadd.f32 %v271_v55, %v270_v12  ;;  %v283_v27 = vadd.f32 %v282_v13, %v281_v15  ;;  %v290_v28 = vsub.f32 %v286_v8, %v273_v37 }
  0x37   : > { %585 = vpow2.f32 %v302_v29  ;;  %p687_p13 = pnand %p686_p10, %p682_p6 }
  0x38   : > { %587 = vpow2.f32 %v304_v30 }
  0x39   : > { %v578_v34 = vpop.eup %577  ;;  %589 = vpow2.f32 %v306_v32 }
  0x3a   : > { %v580_v35 = vpop.eup %579  ;;  %v256_v36 = vsel %vm236_vm0, %v578_v34, 0.0  ;;  %591 = vpow2.f32 %v308_v33  ;;  %v291_v33 = vsub.f32 %v287_v9, %v274_v41 }
  0x3b   : > { %v582_v38 = vpop.eup %581  ;;  %v257_v39 = vsel %vm236_vm0, %v580_v35, 0.0 }
  0x3c   : > { %v584_v42 = vpop.eup %583  ;;  %v258_v44 = vadd.f32 %v257_v39, %v256_v36  ;;  %v259_v45 = vsel %vm236_vm0, %v582_v38, 0.0  ;;  %v292_v36 = vsub.f32 %v288_v21, %v275_v56 }
  0x3d   : > { %v261_v47 = vsel %vm236_vm0, %v584_v42, 0.0  ;;  %v586_v52 = vpop.eup %585 }
  0x3e   : > { %v260_v51 = vadd.f32 %v259_v45, %v258_v44  ;;  %v588_v57 = vpop.eup %587  ;;  %v310_v60 = vadd.f32 1.0, %v586_v52  ;;  %v313_v61 = vmul.f32 -0.5, %v586_v52  ;;  %v316_v18 = vand.u32 2147483647, %v586_v52 }
  0x3f   : > { %v590_v62 = vpop.eup %589  ;;  %v319_v5 = vadd.f32 1.0, %v588_v57  ;;  %v322_v6 = vmul.f32 -0.5, %v588_v57  ;;  %v325_v22 = vand.u32 2147483647, %v588_v57  ;;  %v293_v44 = vsub.f32 %v289_v23, %v276_v63 }
  0x40   : > { %v262_v58 = vadd.f32 %v261_v47, %v260_v51  ;;  %v592_v7 = vpop.eup %591  ;;  %v328_v10 = vadd.f32 1.0, %v590_v62  ;;  %v331_v14 = vmul.f32 -0.5, %v590_v62  ;;  %v314_v16 = vadd.f32 1.0, %v313_v61 }
  0x41   : > { %v337_v17 = vadd.f32 1.0, %v592_v7  ;;  %v323_v19 = vadd.f32 1.0, %v322_v6  ;;  %v340_v20 = vmul.f32 -0.5, %v592_v7  ;;  %v334_v24 = vand.u32 2147483647, %v590_v62 }
  0x42   : > { %593 = vlog2.f32 %v262_v58  ;;  %v332_v1 = vadd.f32 1.0, %v331_v14  ;;  %v315_v29 = vmul.f32 %v586_v52, %v314_v16  ;;  %v343_v30 = vand.u32 2147483647, %v592_v7 }
  0x43   : > { %595 = vlog2.f32 %v310_v60  ;;  %v341_v25 = vadd.f32 1.0, %v340_v20  ;;  %vm928_vm1 = vcmp.lt.f32.partialorder %v316_v18, 0.0004427343  ;;  %v324_v3 = vmul.f32 %v588_v57, %v323_v19 }
  0x44   : > { %597 = vlog2.f32 %v319_v5  ;;  %vm932_vm2 = vcmp.lt.f32.partialorder %v325_v22, 0.0004427343  ;;  %v333_v39 = vmul.f32 %v590_v62, %v332_v1  ;;  %vm335_vm3 = vcmp.lt.f32.partialorder %v334_v24, 0.0004427343  ;;  %v360_v5 = vld [vmem:[#allocation2] sm:$0x3] }
  0x45   : > { %599 = vlog2.f32 %v328_v10  ;;  %v342_v43 = vmul.f32 %v592_v7, %v341_v25  ;;  %vm344_vm4 = vcmp.lt.f32.partialorder %v343_v30, 0.0004427343 }
  0x46   : > { %601 = vlog2.f32 %v337_v17 }
  0x48   : > { %v594_v26 = vpop.eup %593 }
  0x49   : > { %v596_v31 = vpop.eup %595  ;;  %v264_v32 = vmul.f32 0.6931472, %v594_v26 }
  0x4a   : > { %v598_v35 = vpop.eup %597  ;;  %v312_v38 = vmul.f32 0.6931472, %v596_v31 }
  0x4b   : > { %v600_v40 = vpop.eup %599  ;;  %v265_v37 = vadd.f32 %v264_v32, %v890_v11  ;;  %v321_v42 = vmul.f32 0.6931472, %v598_v35 }
  0x4c   : > { %v602_v41 = vpop.eup %601  ;;  %v318_v45 = vsel %vm928_vm1, %v315_v29, %v312_v38  ;;  %v330_v46 = vmul.f32 0.6931472, %v600_v40 }
  0x4d   : > { %v284_v47 = vmul.f32 %v272_v2, %v265_v37  ;;  %v327_v48 = vsel %vm932_vm2, %v324_v3, %v321_v42  ;;  %v339_v49 = vmul.f32 0.6931472, %v602_v41  ;;  %v346_v50 = vadd.f32 %v318_v45, %v290_v28 }
  0x4e   : > { %v336_v51 = vsel %vm335_vm3, %v333_v39, %v330_v46  ;;  %v347_v52 = vadd.f32 %v327_v48, %v291_v33 }
  0x4f   : > { %v345_v53 = vsel %vm344_vm4, %v342_v43, %v339_v49  ;;  %v348_v11 = vadd.f32 %v336_v51, %v292_v36  ;;  %v350_v54 = vsel %vm236_vm0, %v346_v50, 0.0  ;;  %v285_v57 = vsub.f32 %v284_v47, %v283_v27 }
  0x50   : > { %v349_v55 = vadd.f32 %v345_v53, %v293_v44  ;;  %v351_v56 = vsel %vm236_vm0, %v347_v52, 0.0 }
  0x51   : > { %v352_v58 = vadd.f32 %v351_v56, %v350_v54  ;;  %v353_v59 = vsel %vm236_vm0, %v348_v11, 0.0  ;;  %v357_v63 = vmul.f32 0.001171875, %v285_v57 }
  0x52   : > { %v355_v60 = vsel %vm236_vm0, %v349_v55, 0.0 }
  0x53   : > { %v354_v61 = vadd.f32 %v353_v59, %v352_v58 }
  0x55   : > { %v356_v62 = vadd.f32 %v355_v60, %v354_v61 }
  0x57   : > { %v358_v0 = vmul.f32 0.0001953125, %v356_v62 }
  0x59   : > { %v359_v6 = vadd.f32 %v358_v0, %v357_v63 }
  0x5b   : > { %v362_v7 = vadd.f32 %v360_v5, %v359_v6 }
  0x5d   : > { %363 = vst [vmem:[#allocation2] sm:$0x3] %v362_v7 }
  0x64   : > { %v367_v8 = vld [vmem:[#allocation2] sm:$0x3] }
  0x65   : > { %v368_v9 = vsel %vm236_vm0, %v367_v8, 0.0 }
  0x66   : > { %v369_v10 = vrot.slane %v368_v9, 4 }
  0x68   : > { %v370_v12 = vadd.f32 %v369_v10, %v368_v9 }
  0x6a   : > { %v371_v13 = vrot.slane %v370_v12, 2 }
  0x6c   : > { %v372_v14 = vadd.f32 %v371_v13, %v370_v12 }
  0x6e   : > { %v373_v15 = vrot.slane %v372_v14, 1 }
  0x70   : > { %v374_v16 = vadd.f32 %v373_v15, %v372_v14 }
  0x72   : > { %375 = vst [vmem:[%s222_s8] sm:$0x1] %v374_v16 }
  0x73   : > { %690 = shalt.err (!%p687_p13)
}
  0x74   : > { %511 = dma.vmem_to_hbm [thread:$0]  (%p820_p9), %s388_s15, 16, %s390_s16, %s377_s18  }
  0x75 PF: > { %s401_s3 = sand.u32 1, %s729_s9   ;;  %p521_p0 = pnand %p493_p12, %p827_p11 }
  0x76   : > { %s402_s5 = scalar_lea.sflag [#allocation5], %s401_s3 }
  0x77   : > { %p522_p1 = pneg %p521_p0 }
  0x79   : > { %724 = dma.done.wait (%p522_p1), %s402_s5, 16  }
  0x7a   : > { %726 = vsyncadd (%p522_p1), %s402_s5, 4294967280  ;;  %s21_s14 = sadd.s32 1, %s749_s14   ;;  %s997_s9 = smov %s733_s10 }
  0x7b   : > { %p18_p2 = scmp.ge.s32.totalorder %s21_s14, 4   ;;  %s998_s10 = smov %s737_s11 }
  0x7c   : > { %s999_s11 = smov %s825_s23  ;;  %s1000_s12 = smov %s745_s13 }
  0x7d   : > { %s1001_s13 = smov %s1003_s17  ;;  %20 = sbr.rel (!%p18_p2) target bundleno = 8 (0x8), region = 94 }
  0x82   :  { %407 = vsyncpa [#allocation4], 1 }
  0x83   :  { %409 = vsyncpa [#allocation4 + $0x1], 1 }
  0x84   :  { %410 = vsyncpa [#allocation7], 1 }
  0x85   :  { %412 = vsyncpa [#allocation7 + $0x1], 1 }
  0x86   :  { %413 = vsyncpa [#allocation5], 1 }
  0x87   :  { %415 = vsyncpa [#allocation5 + $0x1], 1 }

</bundles_post_ra>
